<compile_context>
chip_gen: v7x
topology: tpu7x:2x2x1
jax: 0.10.0
libtpu: 0.0.40
codegen_flags: <defaults>
</compile_context>

<pallas_src>
import functools

import jax
import jax.numpy as jnp
from jax.experimental import pallas as pl
from jax.experimental.pallas import tpu as pltpu

STATE_SIZE = 212
ACTION_SIZE = 39
FC1 = 512
FC2 = 265
FC3 = 128


def _round_up(x: int, m: int) -> int:
    return (x + m - 1) // m * m


def critic_kernel(s_ref, a_ref,
                  w1_ref, b1_ref,
                  w2x_ref, w2a_ref, b2_ref,
                  w3_ref, b3_ref,
                  w4_ref, b4_ref,
                  out_ref):
    # Inputs arrive as f32 tiles; cast to bf16 for the MXU, accumulate in f32.
    s = s_ref[...].astype(jnp.bfloat16)
    a = a_ref[...].astype(jnp.bfloat16)

    # fc1 + relu
    h1 = jnp.dot(s, w1_ref[...], preferred_element_type=jnp.float32)
    h1 = jnp.maximum(h1 + b1_ref[...], 0.0)

    # cat((h1, action), dim=1) -> fc2 + relu, as a split matmul.
    h2 = jnp.dot(h1.astype(jnp.bfloat16), w2x_ref[...],
                 preferred_element_type=jnp.float32)
    h2 = h2 + jnp.dot(a, w2a_ref[...], preferred_element_type=jnp.float32)
    h2 = jnp.maximum(h2 + b2_ref[...], 0.0)

    # fc3 + relu
    h3 = jnp.dot(h2.astype(jnp.bfloat16), w3_ref[...],
                 preferred_element_type=jnp.float32)
    h3 = jnp.maximum(h3 + b3_ref[...], 0.0)

    # fc4 (N=1) + relu: VPU multiply + lane reduction (XLU), skip the MXU.
    q = jnp.sum(h3 * w4_ref[...], axis=-1, keepdims=True) + b4_ref[...]
    out_ref[...] = jnp.maximum(q, 0.0).astype(out_ref.dtype)


def prepare_params(raw_params):
    """One-time (outside jit) conversion of nn.Linear-style params to kernel form.

    Weights are stored (in_features, out_features) and pre-cast to bf16; the fc2
    weight is pre-split into the fc1-output part and the action part; biases stay
    f32; the fc4 weight is kept as an f32 (1, FC3) row for the VPU reduction.
    """
    w1, b1, w2, b2, w3, b3, w4, b4 = raw_params
    return (
        w1.astype(jnp.bfloat16),
        b1.reshape(1, -1).astype(jnp.float32),
        w2[:FC1, :].astype(jnp.bfloat16),
        w2[FC1:, :].astype(jnp.bfloat16),
        b2.reshape(1, -1).astype(jnp.float32),
        w3.astype(jnp.bfloat16),
        b3.reshape(1, -1).astype(jnp.float32),
        w4.reshape(1, -1).astype(jnp.float32),   # (1, FC3)
        b4.reshape(1, 1).astype(jnp.float32),    # (1, 1)
    )


@functools.partial(jax.jit, static_argnames=("block_b",))
def critic_forward(state, action, kparams, block_b=512):
    """state: (B, 212) f32, action: (B, 39) f32, kparams: output of prepare_params."""
    B = state.shape[0]

    # Batch tile: multiple of 8 (sublane), capped by block_b (multiple of 256 ideal).
    tm = min(block_b, _round_up(B, 8))
    Bp = _round_up(B, tm)
    if Bp != B:
        state = jnp.pad(state, ((0, Bp - B), (0, 0)))
        action = jnp.pad(action, ((0, Bp - B), (0, 0)))

    nb = Bp // tm

    in_specs = [
        pl.BlockSpec((tm, STATE_SIZE), lambda i: (i, 0)),
        pl.BlockSpec((tm, ACTION_SIZE), lambda i: (i, 0)),
    ] + [
        # Weights / biases: full array, constant index -> stay resident in VMEM.
        pl.BlockSpec(p.shape, lambda i: (0, 0)) for p in kparams
    ]

    out = pl.pallas_call(
        critic_kernel,
        out_shape=jax.ShapeDtypeStruct((Bp, 1), jnp.float32),
        grid_spec=pltpu.PrefetchScalarGridSpec(
            num_scalar_prefetch=0,
            grid=(nb,),
            in_specs=in_specs,
            out_specs=pl.BlockSpec((tm, 1), lambda i: (i, 0)),
        ),
        compiler_params=pltpu.CompilerParams(
            dimension_semantics=("parallel",),
        ),
    )(state, action, *kparams)

    return out[:B] if Bp != B else out


def init_params(key):
    """Deterministic init mirroring nn.Linear: U(-1/sqrt(fan_in), 1/sqrt(fan_in))."""
    def linear(key, fan_in, fan_out):
        kw, kb = jax.random.split(key)
        bound = 1.0 / jnp.sqrt(float(fan_in))
        w = jax.random.uniform(kw, (fan_in, fan_out), jnp.float32, -bound, bound)
        b = jax.random.uniform(kb, (fan_out,), jnp.float32, -bound, bound)
        return w, b

    k1, k2, k3, k4 = jax.random.split(key, 4)
    w1, b1 = linear(k1, STATE_SIZE, FC1)
    w2, b2 = linear(k2, FC1 + ACTION_SIZE, FC2)
    w3, b3 = linear(k3, FC2, FC3)
    w4, b4 = linear(k4, FC3, 1)
    return (w1, b1, w2, b2, w3, b3, w4, b4)


def reference_forward_f32(state, action, raw_params):
    """Pure f32 reference matching the PyTorch module semantics."""
    w1, b1, w2, b2, w3, b3, w4, b4 = raw_params
    x = jnp.maximum(state @ w1 + b1, 0.0)
    x = jnp.concatenate([x, action], axis=1)
    x = jnp.maximum(x @ w2 + b2, 0.0)
    x = jnp.maximum(x @ w3 + b3, 0.0)
    x = jnp.maximum(x @ w4 + b4, 0.0)
    return x


def reference_forward_bf16(state, action, raw_params):
    """Reference that mimics the kernel's bf16-input / f32-accumulate matmuls."""
    w1, b1, w2, b2, w3, b3, w4, b4 = raw_params
    bf = jnp.bfloat16
    x = jnp.dot(state.astype(bf), w1.astype(bf),
                preferred_element_type=jnp.float32) + b1
    x = jnp.maximum(x, 0.0)
    x = jnp.concatenate([x.astype(bf), action.astype(bf)], axis=1)
    x = jnp.dot(x, w2.astype(bf), preferred_element_type=jnp.float32) + b2
    x = jnp.maximum(x, 0.0)
    x = jnp.dot(x.astype(bf), w3.astype(bf),
                preferred_element_type=jnp.float32) + b3
    x = jnp.maximum(x, 0.0)
    x = jnp.maximum(jnp.sum(x * w4.reshape(1, -1), axis=-1, keepdims=True) + b4, 0.0)
    return x


if __name__ == "__main__":
    key = jax.random.PRNGKey(0)
    kp, ks, ka = jax.random.split(key, 3)

    raw_params = init_params(kp)
    kparams = prepare_params(raw_params)

    # Small demo batch (single grid step).
    B = 8
    state = jax.random.normal(ks, (B, STATE_SIZE), jnp.float32)
    action = jax.random.normal(ka, (B, ACTION_SIZE), jnp.float32)

    out = critic_forward(state, action, kparams)
    jax.block_until_ready(out)
    assert out.shape == (B, 1), out.shape

    ref_bf16 = reference_forward_bf16(state, action, raw_params)
    ref_f32 = reference_forward_f32(state, action, raw_params)
    assert jnp.allclose(out, ref_bf16, atol=2e-3, rtol=2e-3), "mismatch vs bf16 reference"
    assert jnp.allclose(out, ref_f32, atol=5e-2, rtol=5e-2), "mismatch vs f32 reference"

    # Second case: batch not divisible by the tile -> exercises grid>1 + padding path.
    B2 = 70
    state2 = jax.random.normal(ks, (B2, STATE_SIZE), jnp.float32)
    action2 = jax.random.normal(ka, (B2, ACTION_SIZE), jnp.float32)
    out2 = critic_forward(state2, action2, kparams, block_b=64)
    jax.block_until_ready(out2)
    assert out2.shape == (B2, 1), out2.shape
    ref2 = reference_forward_bf16(state2, action2, raw_params)
    assert jnp.allclose(out2, ref2, atol=2e-3, rtol=2e-3), "mismatch (tiled batch)"

    print("KERNEL_OK")
</pallas_src>

<mosaic_0001>
module attributes {stable_mosaic.version = 11 : i64} {
  func.func @critic_kernel(%arg0: i32, %arg1: memref<8x212xf32, #tpu.memory_space<vmem>>, %arg2: memref<8x39xf32, #tpu.memory_space<vmem>>, %arg3: memref<212x512xbf16, #tpu.memory_space<vmem>>, %arg4: memref<1x512xf32, #tpu.memory_space<vmem>>, %arg5: memref<512x265xbf16, #tpu.memory_space<vmem>>, %arg6: memref<39x265xbf16, #tpu.memory_space<vmem>>, %arg7: memref<1x265xf32, #tpu.memory_space<vmem>>, %arg8: memref<265x128xbf16, #tpu.memory_space<vmem>>, %arg9: memref<1x128xf32, #tpu.memory_space<vmem>>, %arg10: memref<1x128xf32, #tpu.memory_space<vmem>>, %arg11: memref<1x1xf32, #tpu.memory_space<vmem>>, %arg12: memref<8x1xf32, #tpu.memory_space<vmem>>) attributes {dimension_semantics = [#tpu.dimension_semantics<parallel>], iteration_bounds = array<i64: 1>, scalar_prefetch = 0 : i64, scratch_operands = 0 : i64, tpu.core_type = #tpu.core_type<tc>, window_params = [{transform_indices = @transform_0, window_bounds = array<i64: 8, 212>}, {transform_indices = @transform_1, window_bounds = array<i64: 8, 39>}, {pipeline_mode = #tpu.pipeline_mode<synchronous>, transform_indices = @transform_2, window_bounds = array<i64: 212, 512>}, {pipeline_mode = #tpu.pipeline_mode<synchronous>, transform_indices = @transform_3, window_bounds = array<i64: 1, 512>}, {pipeline_mode = #tpu.pipeline_mode<synchronous>, transform_indices = @transform_4, window_bounds = array<i64: 512, 265>}, {pipeline_mode = #tpu.pipeline_mode<synchronous>, transform_indices = @transform_5, window_bounds = array<i64: 39, 265>}, {pipeline_mode = #tpu.pipeline_mode<synchronous>, transform_indices = @transform_6, window_bounds = array<i64: 1, 265>}, {pipeline_mode = #tpu.pipeline_mode<synchronous>, transform_indices = @transform_7, window_bounds = array<i64: 265, 128>}, {pipeline_mode = #tpu.pipeline_mode<synchronous>, transform_indices = @transform_8, window_bounds = array<i64: 1, 128>}, {pipeline_mode = #tpu.pipeline_mode<synchronous>, transform_indices = @transform_9, window_bounds = array<i64: 1, 128>}, {pipeline_mode = #tpu.pipeline_mode<synchronous>, transform_indices = @transform_10, window_bounds = array<i64: 1, 1>}, {transform_indices = @transform_11, window_bounds = array<i64: 8, 1>}]} {
    %c0 = arith.constant 0 : index
    %c0_0 = arith.constant 0 : index
    %0 = vector.load %arg1[%c0, %c0_0] : memref<8x212xf32, #tpu.memory_space<vmem>>, vector<8x212xf32>
    %1 = arith.truncf %0 : vector<8x212xf32> to vector<8x212xbf16>
    %c0_1 = arith.constant 0 : index
    %c0_2 = arith.constant 0 : index
    %2 = vector.load %arg2[%c0_1, %c0_2] : memref<8x39xf32, #tpu.memory_space<vmem>>, vector<8x39xf32>
    %3 = arith.truncf %2 : vector<8x39xf32> to vector<8x39xbf16>
    %c0_3 = arith.constant 0 : index
    %c0_4 = arith.constant 0 : index
    %4 = vector.load %arg3[%c0_3, %c0_4] : memref<212x512xbf16, #tpu.memory_space<vmem>>, vector<212x512xbf16>
    %cst = arith.constant dense<0.000000e+00> : vector<8x512xf32>
    %5 = tpu.matmul %1, %4, %cst {dimension_numbers = #tpu.dot_dimension_numbers<[1], [0], [0], [1], [0, 0, 1, 1], [], []>} : vector<8x212xbf16>, vector<212x512xbf16>, vector<8x512xf32> -> vector<8x512xf32>
    %c0_5 = arith.constant 0 : index
    %c0_6 = arith.constant 0 : index
    %6 = vector.load %arg4[%c0_5, %c0_6] : memref<1x512xf32, #tpu.memory_space<vmem>>, vector<1x512xf32>
    %7 = vector.broadcast %6 : vector<1x512xf32> to vector<8x512xf32>
    %8 = arith.addf %5, %7 : vector<8x512xf32>
    %cst_7 = arith.constant 0.000000e+00 : f32
    %9 = vector.broadcast %cst_7 : f32 to vector<8x512xf32>
    %10 = arith.maximumf %8, %9 : vector<8x512xf32>
    %11 = arith.truncf %10 : vector<8x512xf32> to vector<8x512xbf16>
    %c0_8 = arith.constant 0 : index
    %c0_9 = arith.constant 0 : index
    %12 = vector.load %arg5[%c0_8, %c0_9] : memref<512x265xbf16, #tpu.memory_space<vmem>>, vector<512x265xbf16>
    %cst_10 = arith.constant dense<0.000000e+00> : vector<8x265xf32>
    %13 = tpu.matmul %11, %12, %cst_10 {dimension_numbers = #tpu.dot_dimension_numbers<[1], [0], [0], [1], [0, 0, 1, 1], [], []>} : vector<8x512xbf16>, vector<512x265xbf16>, vector<8x265xf32> -> vector<8x265xf32>
    %c0_11 = arith.constant 0 : index
    %c0_12 = arith.constant 0 : index
    %14 = vector.load %arg6[%c0_11, %c0_12] : memref<39x265xbf16, #tpu.memory_space<vmem>>, vector<39x265xbf16>
    %cst_13 = arith.constant dense<0.000000e+00> : vector<8x265xf32>
    %15 = tpu.matmul %3, %14, %cst_13 {dimension_numbers = #tpu.dot_dimension_numbers<[1], [0], [0], [1], [0, 0, 1, 1], [], []>} : vector<8x39xbf16>, vector<39x265xbf16>, vector<8x265xf32> -> vector<8x265xf32>
    %16 = arith.addf %13, %15 : vector<8x265xf32>
    %c0_14 = arith.constant 0 : index
    %c0_15 = arith.constant 0 : index
    %17 = vector.load %arg7[%c0_14, %c0_15] : memref<1x265xf32, #tpu.memory_space<vmem>>, vector<1x265xf32>
    %18 = vector.broadcast %17 : vector<1x265xf32> to vector<8x265xf32>
    %19 = arith.addf %16, %18 : vector<8x265xf32>
    %cst_16 = arith.constant 0.000000e+00 : f32
    %20 = vector.broadcast %cst_16 : f32 to vector<8x265xf32>
    %21 = arith.maximumf %19, %20 : vector<8x265xf32>
    %22 = arith.truncf %21 : vector<8x265xf32> to vector<8x265xbf16>
    %c0_17 = arith.constant 0 : index
    %c0_18 = arith.constant 0 : index
    %23 = vector.load %arg8[%c0_17, %c0_18] : memref<265x128xbf16, #tpu.memory_space<vmem>>, vector<265x128xbf16>
    %cst_19 = arith.constant dense<0.000000e+00> : vector<8x128xf32>
    %24 = tpu.matmul %22, %23, %cst_19 {dimension_numbers = #tpu.dot_dimension_numbers<[1], [0], [0], [1], [0, 0, 1, 1], [], []>} : vector<8x265xbf16>, vector<265x128xbf16>, vector<8x128xf32> -> vector<8x128xf32>
    %c0_20 = arith.constant 0 : index
    %c0_21 = arith.constant 0 : index
    %25 = vector.load %arg9[%c0_20, %c0_21] : memref<1x128xf32, #tpu.memory_space<vmem>>, vector<1x128xf32>
    %26 = vector.broadcast %25 : vector<1x128xf32> to vector<8x128xf32>
    %27 = arith.addf %24, %26 : vector<8x128xf32>
    %cst_22 = arith.constant 0.000000e+00 : f32
    %28 = vector.broadcast %cst_22 : f32 to vector<8x128xf32>
    %29 = arith.maximumf %27, %28 : vector<8x128xf32>
    %c0_23 = arith.constant 0 : index
    %c0_24 = arith.constant 0 : index
    %30 = vector.load %arg10[%c0_23, %c0_24] : memref<1x128xf32, #tpu.memory_space<vmem>>, vector<1x128xf32>
    %31 = vector.broadcast %30 : vector<1x128xf32> to vector<8x128xf32>
    %32 = arith.mulf %29, %31 : vector<8x128xf32>
    %cst_25 = arith.constant dense<0.000000e+00> : vector<8xf32>
    %33 = vector.multi_reduction <add>, %32, %cst_25 [1] : vector<8x128xf32> to vector<8xf32>
    %34 = vector.shape_cast %33 : vector<8xf32> to vector<8x1xf32>
    %c0_26 = arith.constant 0 : index
    %c0_27 = arith.constant 0 : index
    %35 = vector.load %arg11[%c0_26, %c0_27] : memref<1x1xf32, #tpu.memory_space<vmem>>, vector<1x1xf32>
    %36 = vector.broadcast %35 : vector<1x1xf32> to vector<8x1xf32>
    %37 = arith.addf %34, %36 : vector<8x1xf32>
    %cst_28 = arith.constant 0.000000e+00 : f32
    %38 = vector.broadcast %cst_28 : f32 to vector<8x1xf32>
    %39 = arith.maximumf %37, %38 : vector<8x1xf32>
    %c0_29 = arith.constant 0 : index
    %c0_30 = arith.constant 0 : index
    %40 = vector.load %arg12[%c0_29, %c0_30] : memref<8x1xf32, #tpu.memory_space<vmem>>, vector<8x1xf32>
    tpu.vector_store %arg12[%c0_29, %c0_30], %39 {strides = array<i32>} : memref<8x1xf32, #tpu.memory_space<vmem>>, vector<8x1xf32>,
    return
  }
  func.func @transform_0(%arg0: i32) -> (i32, i32) {
    %c0_i32 = arith.constant 0 : i32
    %c0_i32_0 = arith.constant 0 : i32
    return %arg0, %c0_i32 : i32, i32
  }
  func.func @transform_1(%arg0: i32) -> (i32, i32) {
    %c0_i32 = arith.constant 0 : i32
    %c0_i32_0 = arith.constant 0 : i32
    return %arg0, %c0_i32 : i32, i32
  }
  func.func @transform_2(%arg0: i32) -> (i32, i32) {
    %c0_i32 = arith.constant 0 : i32
    %c0_i32_0 = arith.constant 0 : i32
    %c0_i32_1 = arith.constant 0 : i32
    return %c0_i32, %c0_i32_0 : i32, i32
  }
  func.func @transform_3(%arg0: i32) -> (i32, i32) {
    %c0_i32 = arith.constant 0 : i32
    %c0_i32_0 = arith.constant 0 : i32
    %c0_i32_1 = arith.constant 0 : i32
    return %c0_i32, %c0_i32_0 : i32, i32
  }
  func.func @transform_4(%arg0: i32) -> (i32, i32) {
    %c0_i32 = arith.constant 0 : i32
    %c0_i32_0 = arith.constant 0 : i32
    %c0_i32_1 = arith.constant 0 : i32
    return %c0_i32, %c0_i32_0 : i32, i32
  }
  func.func @transform_5(%arg0: i32) -> (i32, i32) {
    %c0_i32 = arith.constant 0 : i32
    %c0_i32_0 = arith.constant 0 : i32
    %c0_i32_1 = arith.constant 0 : i32
    return %c0_i32, %c0_i32_0 : i32, i32
  }
  func.func @transform_6(%arg0: i32) -> (i32, i32) {
    %c0_i32 = arith.constant 0 : i32
    %c0_i32_0 = arith.constant 0 : i32
    %c0_i32_1 = arith.constant 0 : i32
    return %c0_i32, %c0_i32_0 : i32, i32
  }
  func.func @transform_7(%arg0: i32) -> (i32, i32) {
    %c0_i32 = arith.constant 0 : i32
    %c0_i32_0 = arith.constant 0 : i32
    %c0_i32_1 = arith.constant 0 : i32
    return %c0_i32, %c0_i32_0 : i32, i32
  }
  func.func @transform_8(%arg0: i32) -> (i32, i32) {
    %c0_i32 = arith.constant 0 : i32
    %c0_i32_0 = arith.constant 0 : i32
    %c0_i32_1 = arith.constant 0 : i32
    return %c0_i32, %c0_i32_0 : i32, i32
  }
  func.func @transform_9(%arg0: i32) -> (i32, i32) {
    %c0_i32 = arith.constant 0 : i32
    %c0_i32_0 = arith.constant 0 : i32
    %c0_i32_1 = arith.constant 0 : i32
    return %c0_i32, %c0_i32_0 : i32, i32
  }
  func.func @transform_10(%arg0: i32) -> (i32, i32) {
    %c0_i32 = arith.constant 0 : i32
    %c0_i32_0 = arith.constant 0 : i32
    %c0_i32_1 = arith.constant 0 : i32
    return %c0_i32, %c0_i32_0 : i32, i32
  }
  func.func @transform_11(%arg0: i32) -> (i32, i32) {
    %c0_i32 = arith.constant 0 : i32
    %c0_i32_0 = arith.constant 0 : i32
    return %arg0, %c0_i32 : i32, i32
  }
}

</mosaic_0001>

<bundles_post_ra>
// kernel: critic_forward.1
= control target key start
LH: loop header
LB: loop body
LE: loop exit
PB: predicated region body
PF: predicated region fallthrough
CT: control target
= control target key end

     0   :  { %vm683_vm0 = vcmask 1043456   ;;  %v2252_v2 = vmov 65535   ;;  %vm393_vm1 = vcmask 687104   ;;  %vm397_vm2 = vcmask 1041408   ;;  %s2920_s2 = inlined_call_operand.vmem [shape: bf16[212,512], index: 2, kind: input, shape index: {}]   ;;  %s2921_s0 = inlined_call_operand.vmem [shape: f32[8,212], index: 0, kind: input, shape index: {}]   ;;  %s2922_s5 = inlined_call_operand.vmem [shape: bf16[39,265], index: 5, kind: input, shape index: {}]   ;;  %s2923_s4 = inlined_call_operand.vmem [shape: bf16[512,265], index: 4, kind: input, shape index: {}]   ;;  %s2924_s1 = inlined_call_operand.vmem [shape: f32[8,39], index: 1, kind: input, shape index: {}]   ;;  %s2925_s7 = inlined_call_operand.vmem [shape: bf16[265,128], index: 7, kind: input, shape index: {}]   ;;  %s2926_s3 = inlined_call_operand.vmem [shape: f32[1,512], index: 3, kind: input, shape index: {}]   ;;  %s2927_s6 = inlined_call_operand.vmem [shape: f32[1,265], index: 6, kind: input, shape index: {}]   ;;  %s2928_s10 = inlined_call_operand.<no memory space> [shape: f32[1,1], index: 10, kind: input, shape index: {}]   ;;  %s2929_s8 = inlined_call_operand.vmem [shape: f32[1,128], index: 8, kind: input, shape index: {}]   ;;  %s2930_s9 = inlined_call_operand.vmem [shape: f32[1,128], index: 9, kind: input, shape index: {}]   ;;  %s2931_s11 = inlined_call_operand.vmem [shape: f32[8,1], index: 11, kind: output, shape index: {}]  }
   0x1   :  { %v2014_v0 = vld [vmem:[%s2920_s2 + $0x4] ss:$16 sps:$4 sm:$0xff]   ;;  %v2016_v1 = vld [vmem:[%s2920_s2 + $0xc] ss:$16 sps:$4 sm:$0xff]   ;;  %v2324_v3 = vsel %vm683_vm0, 4294967295, %v2252_v2  ;;  %vm682_vm3 = vcmask 1042432  }
   0x2   :  { %410 = vmatprep.subr.bf16.mxu0 %v2014_v0  ;;  %v2018_v4 = vld [vmem:[%s2920_s2] ss:$16 sps:$4 sm:$0xff]   ;;  %v2019_v5 = vld [vmem:[%s2920_s2 + $0x8] ss:$16 sps:$4 sm:$0xff]   ;;  %451 = vmatprep.subr.bf16.mxu1 %v2016_v1  ;;  %v2020_v6 = vld [vmem:[%s2920_s2 + $0x24] ss:$16 sps:$4 sm:$0xff]  }
   0x3   :  { %411 = vmatpush1.bf16.msra.mxu0 %v2018_v4  ;;  %452 = vmatpush1.bf16.msra.mxu1 %v2019_v5  ;;  %v2022_v7 = vld [vmem:[%s2920_s2 + $0x2c] ss:$16 sps:$4 sm:$0xff]   ;;  %v2024_v8 = vld [vmem:[%s2920_s2 + $0x20] ss:$16 sps:$4 sm:$0xff]   ;;  %v2025_v9 = vld [vmem:[%s2920_s2 + $0x28] ss:$16 sps:$4 sm:$0xff]  }
   0x4   :  { %412 = vmatprep.subr.bf16.mxu0 %v2020_v6  ;;  %453 = vmatprep.subr.bf16.mxu1 %v2022_v7  ;;  %v2026_v10 = vld [vmem:[%s2920_s2 + $0x44] ss:$16 sps:$4 sm:$0xff]   ;;  %v2028_v11 = vld [vmem:[%s2920_s2 + $0x4c] ss:$16 sps:$4 sm:$0xff]   ;;  %v2030_v12 = vld [vmem:[%s2920_s2 + $0x40] ss:$16 sps:$4 sm:$0xff]  }
   0x5   :  { %v2031_v13 = vld [vmem:[%s2920_s2 + $0x48] ss:$16 sps:$4 sm:$0xff]   ;;  %v2032_v14 = vld [vmem:[%s2920_s2 + $0x64] ss:$16 sps:$4 sm:$0xff]   ;;  %v2034_v15 = vld [vmem:[%s2920_s2 + $0x6c] ss:$16 sps:$4 sm:$0xff]  }
   0x6   :  { %v2036_v16 = vld [vmem:[%s2920_s2 + $0x60] ss:$16 sps:$4 sm:$0xff]   ;;  %v2037_v17 = vld [vmem:[%s2920_s2 + $0x68] ss:$16 sps:$4 sm:$0xff]   ;;  %v2038_v18 = vld [vmem:[%s2920_s2 + $0x84] ss:$16 sps:$4 sm:$0xff]  }
   0x7   :  { %413 = vmatpush1.bf16.msra.mxu0 %v2024_v8  ;;  %454 = vmatpush1.bf16.msra.mxu1 %v2025_v9  ;;  %v2040_v19 = vld [vmem:[%s2920_s2 + $0x8c] ss:$16 sps:$4 sm:$0xff]   ;;  %v2042_v20 = vld [vmem:[%s2920_s2 + $0x80] ss:$16 sps:$4 sm:$0xff]   ;;  %v2043_v21 = vld [vmem:[%s2920_s2 + $0x88] ss:$16 sps:$4 sm:$0xff]  }
   0x8   :  { %414 = vmatprep.subr.bf16.mxu0 %v2026_v10  ;;  %455 = vmatprep.subr.bf16.mxu1 %v2028_v11  ;;  %v2044_v22 = vld [vmem:[%s2920_s2 + $0xa4] ss:$16 sps:$4 sm:$0xff]   ;;  %v2046_v23 = vld [vmem:[%s2920_s2 + $0xac] ss:$16 sps:$4 sm:$0xff]   ;;  %v2048_v24 = vld [vmem:[%s2920_s2 + $0xa0] ss:$16 sps:$4 sm:$0xff]  }
   0x9   :  { %v2049_v25 = vld [vmem:[%s2920_s2 + $0xa8] ss:$16 sps:$4 sm:$0xff]   ;;  %v2050_v26 = vld [vmem:[%s2920_s2 + $0xc4] ss:$16 sps:$4 sm:$0xff]   ;;  %v2052_v27 = vld [vmem:[%s2920_s2 + $0xcc] ss:$16 sps:$4 sm:$0xff]  }
   0xa   :  { %v2054_v28 = vld [vmem:[%s2920_s2 + $0xc0] ss:$16 sps:$4 sm:$0xff]   ;;  %v2055_v29 = vld [vmem:[%s2920_s2 + $0xc8] ss:$16 sps:$4 sm:$0xff]   ;;  %v2056_v30 = vld [vmem:[%s2920_s2 + $0xe4] ss:$16 sps:$4 sm:$0xff]  }
   0xb   :  { %415 = vmatpush1.bf16.msra.mxu0 %v2030_v12  ;;  %456 = vmatpush1.bf16.msra.mxu1 %v2031_v13  ;;  %v2058_v31 = vld [vmem:[%s2920_s2 + $0xec] ss:$16 sps:$4 sm:$0xff]   ;;  %v2060_v32 = vld [vmem:[%s2920_s2 + $0xe0] ss:$16 sps:$4 sm:$0xff]   ;;  %v2061_v33 = vld [vmem:[%s2920_s2 + $0xe8] ss:$16 sps:$4 sm:$0xff]  }
   0xc   :  { %416 = vmatprep.subr.bf16.mxu0 %v2032_v14  ;;  %457 = vmatprep.subr.bf16.mxu1 %v2034_v15  ;;  %v2062_v34 = vld [vmem:[%s2920_s2 + $0x104] ss:$16 sps:$4 sm:$0xff]   ;;  %v2064_v35 = vld [vmem:[%s2920_s2 + $0x10c] ss:$16 sps:$4 sm:$0xff]   ;;  %v2066_v36 = vld [vmem:[%s2920_s2 + $0x100] ss:$16 sps:$4 sm:$0xff]  }
   0xd   :  { %v2067_v37 = vld [vmem:[%s2920_s2 + $0x108] ss:$16 sps:$4 sm:$0xff]   ;;  %v2068_v38 = vld [vmem:[%s2920_s2 + $0x124] ss:$16 sps:$4 sm:$0xff]   ;;  %v2070_v39 = vld [vmem:[%s2920_s2 + $0x12c] ss:$16 sps:$4 sm:$0xff]  }
   0xe   :  { %v2072_v40 = vld [vmem:[%s2920_s2 + $0x120] ss:$16 sps:$4 sm:$0xff]   ;;  %v2073_v41 = vld [vmem:[%s2920_s2 + $0x128] ss:$16 sps:$4 sm:$0xff]   ;;  %v2074_v43 = vld [vmem:[%s2920_s2 + $0x144] ss:$16 sps:$4 sm:$0xff]  }
   0xf   :  { %417 = vmatpush1.bf16.msra.mxu0 %v2036_v16  ;;  %458 = vmatpush1.bf16.msra.mxu1 %v2037_v17  ;;  %v42_v42 = vld [vmem:[%s2921_s0 + $0x8] sm:$0xff]  ;;  %v2078_v46 = vld [vmem:[%s2920_s2 + $0x140] ss:$16 sps:$4 sm:$0xff]   ;;  %v2080_v48 = vld [vmem:[%s2920_s2 + $0x164] ss:$16 sps:$4 sm:$0xff]   ;;  %v684_v7 = vsel %vm682_vm3, 4294967295, %v2252_v2 }
  0x10   :  { %418 = vmatprep.subr.bf16.mxu0 %v2038_v18  ;;  %459 = vmatprep.subr.bf16.mxu1 %v2040_v19  ;;  %v44_v44 = vpack.c.bf16 %v42_v42, %v42_v42  ;;  %v2076_v45 = vld [vmem:[%s2920_s2 + $0x14c] ss:$16 sps:$4 sm:$0xff]   ;;  %v2079_v47 = vld [vmem:[%s2920_s2 + $0x148] ss:$16 sps:$4 sm:$0xff]   ;;  %v2084_v50 = vld [vmem:[%s2920_s2 + $0x160] ss:$16 sps:$4 sm:$0xff]  }
  0x11   :  { %v2082_v49 = vld [vmem:[%s2920_s2 + $0x16c] ss:$16 sps:$4 sm:$0xff]   ;;  %v2085_v51 = vld [vmem:[%s2920_s2 + $0x168] ss:$16 sps:$4 sm:$0xff]   ;;  %v2086_v52 = vld [vmem:[%s2920_s2 + $0x184] ss:$16 sps:$4 sm:$0xff]  }
  0x12   :  { %1791 = vmatprep.mubr.msk.bf16.mxu0 %vm393_vm1, %v44_v44  ;;  %1793 = vmatprep.mubr.msk.bf16.mxu1 %vm393_vm1, %v44_v44  ;;  %v2088_v53 = vld [vmem:[%s2920_s2 + $0x18c] ss:$16 sps:$4 sm:$0xff]   ;;  %v99_v54 = vld [vmem:[%s2920_s2 + $0x1a0] sm:$0x33]  ;;  %v2091_v57 = vld [vmem:[%s2920_s2 + $0x188] ss:$16 sps:$4 sm:$0xff]  }
  0x13   :  { %419 = vmatpush1.bf16.msra.mxu0 %v2042_v20  ;;  %460 = vmatpush1.bf16.msra.mxu1 %v2043_v21  ;;  %v100_v55 = vld [vmem:[%s2920_s2 + $0x1a8] sm:$0x33]  ;;  %v2090_v56 = vld [vmem:[%s2920_s2 + $0x180] ss:$16 sps:$4 sm:$0xff]   ;;  %v1786_v58 = vcombine.low %v99_v54, %v99_v54  ;;  %v1787_v59 = vcombine.high %v99_v54, %v99_v54  ;;  %v685_v12 = vsel %vm683_vm0, %v684_v7, 0  ;;  %v2253_v15 = vmov 0  }
  0x14   :  { %420 = vmatprep.subr.bf16.mxu0 %v2044_v22  ;;  %461 = vmatprep.subr.bf16.mxu1 %v2046_v23  ;;  %v1789_v60 = vcombine.high %v100_v55, %v100_v55  ;;  %v1788_v61 = vcombine.low %v100_v55, %v100_v55  ;;  %v41_v63 = vld [vmem:[%s2921_s0] sm:$0xff]  ;;  %v636_v5 = vld [vmem:[%s2922_s5 + $0x30] sm:$0xff]  ;;  %v2101_v9 = vld [vmem:[%s2922_s5 + $0x1c] ss:$12 sps:$4 sm:$0xff]   ;;  %vm678_vm4 = vcmask 318464   ;;  %vm2255_vm5 = vmmov 0  }
  0x15   :  { %v399_v62 = vsel %vm397_vm2, %v1786_v58, 0  ;;  %v2098_v1 = vld [vmem:[%s2922_s5 + $0x4] ss:$12 sps:$4 sm:$0xff]   ;;  %v43_v6 = vpack.c.bf16 %v41_v63, %v41_v63  ;;  %v2096_v8 = vld [vmem:[%s2922_s5] ss:$12 sps:$4 sm:$0xff]   ;;  %v1801_v10 = vcombine.high %v636_v5, %v636_v5  ;;  %v1800_v14 = vcombine.low %v636_v5, %v636_v5 }
  0x16   :  { %v405_v0 = vsel %vm397_vm2, %v1788_v61, 0  ;;  %v2109_v4 = vld [vmem:[%s2923_s4 + $0x4] ss:$12 sps:$4 sm:$0xff]   ;;  %v2107_v11 = vld [vmem:[%s2923_s4] ss:$12 sps:$4 sm:$0xff]   ;;  %vm1622_vm6 = vcmask 1044480  }
  0x17   :  { %421 = vmatpush1.bf16.msra.mxu0 %v2048_v24  ;;  %462 = vmatpush1.bf16.msra.mxu1 %v2049_v25  ;;  %v2115_v2 = vld [vmem:[%s2923_s4 + $0x1c] ss:$12 sps:$4 sm:$0xff]   ;;  %v2099_v13 = vld [vmem:[%s2922_s5 + $0x18] ss:$12 sps:$4 sm:$0xff]   ;;  %v690_v16 = vand.u32 %v1801_v10, %v685_v12  ;;  %v2121_v18 = vld [vmem:[%s2923_s4 + $0x34] ss:$12 sps:$4 sm:$0xff]   ;;  %v687_v19 = vand.u32 %v1800_v14, %v685_v12 }
  0x18   :  { %422 = vmatprep.subr.bf16.mxu0 %v2050_v26  ;;  %463 = vmatprep.subr.bf16.mxu1 %v2052_v27  ;;  %v2113_v17 = vld [vmem:[%s2923_s4 + $0x18] ss:$12 sps:$4 sm:$0xff]   ;;  %v2119_v21 = vld [vmem:[%s2923_s4 + $0x30] ss:$12 sps:$4 sm:$0xff]   ;;  %v2104_v24 = vld [vmem:[%s2922_s5 + $0x8] ss:$12 sps:$4 sm:$0xff]  }
  0x19   :  { %v45_v20 = vld [vmem:[%s2924_s1] sm:$0xff]  ;;  %v2127_v22 = vld [vmem:[%s2923_s4 + $0x4c] ss:$12 sps:$4 sm:$0xff]   ;;  %v2254_v25 = vmov 0.0   ;;  %v2125_v26 = vld [vmem:[%s2923_s4 + $0x48] ss:$12 sps:$4 sm:$0xff]  }
  0x1a   :  { %v46_v23 = vpack.c.bf16 %v45_v20, %v45_v20  ;;  %v2133_v27 = vld [vmem:[%s2923_s4 + $0x64] ss:$12 sps:$4 sm:$0xff]   ;;  %v2149_v42 = vld [vmem:[%s2923_s4 + $0xa8] ss:$12 sps:$4 sm:$0xff]   ;;  %v2175_v55 = vld [vmem:[%s2923_s4 + $0x10c] ss:$12 sps:$4 sm:$0xff]  }
  0x1b   :  { %423 = vmatpush1.bf16.msra.mxu0 %v2054_v28  ;;  %464 = vmatpush1.bf16.msra.mxu1 %v2055_v29  ;;  %v2105_v28 = vld [vmem:[%s2922_s5 + $0x20] ss:$12 sps:$4 sm:$0xff]   ;;  %v2106_v29 = vld [vmem:[%s2922_s5 + $0x38] ss:$0 sps:$4 sm:$0xff]   ;;  %v2122_v44 = vld [vmem:[%s2923_s4 + $0x1b0] ss:$12 sps:$4 sm:$0xff]  }
  0x1c   :  { %424 = vmatprep.subr.bf16.mxu0 %v2056_v30  ;;  %465 = vmatprep.subr.bf16.mxu1 %v2058_v31  ;;  %v2131_v30 = vld [vmem:[%s2923_s4 + $0x60] ss:$12 sps:$4 sm:$0xff]   ;;  %v2139_v31 = vld [vmem:[%s2923_s4 + $0x7c] ss:$12 sps:$4 sm:$0xff]   ;;  %v2164_v7 = vld [vmem:[%s2923_s4 + $0x258] ss:$12 sps:$4 sm:$0xff]  }
  0x1d   :  { %v2167_v54 = vld [vmem:[%s2923_s4 + $0xf0] ss:$12 sps:$4 sm:$0xff]   ;;  %v2173_v58 = vld [vmem:[%s2923_s4 + $0x108] ss:$12 sps:$4 sm:$0xff]   ;;  %v2154_v61 = vld [vmem:[%s2923_s4 + $0x22c] ss:$12 sps:$4 sm:$0xff]  }
  0x1e   :  { %v2187_v63 = vld [vmem:[%s2923_s4 + $0x13c] ss:$12 sps:$4 sm:$0xff]   ;;  %v2158_v5 = vld [vmem:[%s2923_s4 + $0x240] ss:$12 sps:$4 sm:$0xff]   ;;  %v2188_v14 = vld [vmem:[%s2923_s4 + $0x2b8] ss:$12 sps:$4 sm:$0xff]  }
  0x1f   :  { %425 = vmatpush1.bf16.msra.mxu0 %v2060_v32  ;;  %466 = vmatpush1.bf16.msra.mxu1 %v2061_v33  ;;  %v693_v32 = vand.u32 %v2106_v29, %v685_v12  ;;  %v2112_v33 = vld [vmem:[%s2923_s4 + $0x184] ss:$12 sps:$4 sm:$0xff]   ;;  %v2178_v10 = vld [vmem:[%s2923_s4 + $0x28c] ss:$12 sps:$4 sm:$0xff]   ;;  %vm1618_vm7 = vcmask 72704   ;;  %vm1728_vm8 = vcmask 7168  }
  0x20   :  { %426 = vmatprep.subr.bf16.mxu0 %v2062_v34  ;;  %467 = vmatprep.subr.bf16.mxu1 %v2064_v35  ;;  %v2137_v34 = vld [vmem:[%s2923_s4 + $0x78] ss:$12 sps:$4 sm:$0xff]   ;;  %v2110_v35 = vld [vmem:[%s2923_s4 + $0x180] ss:$12 sps:$4 sm:$0xff]  }
  0x21   :  { %v2184_v12 = vld [vmem:[%s2923_s4 + $0x2a4] ss:$12 sps:$4 sm:$0xff]   ;;  %v2202_v20 = vld [vmem:[%s2923_s4 + $0x2ec] ss:$12 sps:$4 sm:$0xff]  }
  0x23   :  { %427 = vmatpush1.bf16.msra.mxu0 %v2066_v36  ;;  %468 = vmatpush1.bf16.msra.mxu1 %v2067_v37  ;;  %v2145_v36 = vld [vmem:[%s2923_s4 + $0x94] ss:$12 sps:$4 sm:$0xff]   ;;  %v2118_v37 = vld [vmem:[%s2923_s4 + $0x19c] ss:$12 sps:$4 sm:$0xff]  }
  0x24   :  { %428 = vmatprep.subr.bf16.mxu0 %v2068_v38  ;;  %469 = vmatprep.subr.bf16.mxu1 %v2070_v39  ;;  %v2143_v38 = vld [vmem:[%s2923_s4 + $0x90] ss:$12 sps:$4 sm:$0xff]   ;;  %v2151_v39 = vld [vmem:[%s2923_s4 + $0xac] ss:$12 sps:$4 sm:$0xff]  }
  0x27   :  { %429 = vmatpush1.bf16.msra.mxu0 %v2072_v40  ;;  %470 = vmatpush1.bf16.msra.mxu1 %v2073_v41  ;;  %v2116_v40 = vld [vmem:[%s2923_s4 + $0x198] ss:$12 sps:$4 sm:$0xff]   ;;  %v2124_v41 = vld [vmem:[%s2923_s4 + $0x1b4] ss:$12 sps:$4 sm:$0xff]  }
  0x28   :  { %430 = vmatprep.subr.bf16.mxu0 %v2074_v43  ;;  %471 = vmatprep.subr.bf16.mxu1 %v2076_v45  ;;  %v2157_v43 = vld [vmem:[%s2923_s4 + $0xc4] ss:$12 sps:$4 sm:$0xff]   ;;  %v2130_v45 = vld [vmem:[%s2923_s4 + $0x1cc] ss:$12 sps:$4 sm:$0xff]  }
  0x2b   :  { %431 = vmatpush1.bf16.msra.mxu0 %v2078_v46  ;;  %472 = vmatpush1.bf16.msra.mxu1 %v2079_v47  ;;  %v2155_v46 = vld [vmem:[%s2923_s4 + $0xc0] ss:$12 sps:$4 sm:$0xff]   ;;  %v2163_v47 = vld [vmem:[%s2923_s4 + $0xdc] ss:$12 sps:$4 sm:$0xff]  }
  0x2c   :  { %432 = vmatprep.subr.bf16.mxu0 %v2080_v48  ;;  %473 = vmatprep.subr.bf16.mxu1 %v2082_v49  ;;  %v2128_v48 = vld [vmem:[%s2923_s4 + $0x1c8] ss:$12 sps:$4 sm:$0xff]   ;;  %v2136_v49 = vld [vmem:[%s2923_s4 + $0x1e4] ss:$12 sps:$4 sm:$0xff]  }
  0x2f   :  { %433 = vmatpush1.bf16.msra.mxu0 %v2084_v50  ;;  %474 = vmatpush1.bf16.msra.mxu1 %v2085_v51  ;;  %v2161_v50 = vld [vmem:[%s2923_s4 + $0xd8] ss:$12 sps:$4 sm:$0xff]   ;;  %v2169_v51 = vld [vmem:[%s2923_s4 + $0xf4] ss:$12 sps:$4 sm:$0xff]  }
  0x30   :  { %434 = vmatprep.subr.bf16.mxu0 %v2086_v52  ;;  %475 = vmatprep.subr.bf16.mxu1 %v2088_v53  ;;  %v2134_v52 = vld [vmem:[%s2923_s4 + $0x1e0] ss:$12 sps:$4 sm:$0xff]   ;;  %v2142_v53 = vld [vmem:[%s2923_s4 + $0x1fc] ss:$12 sps:$4 sm:$0xff]  }
  0x33   :  { %435 = vmatpush1.bf16.msra.mxu0 %v2090_v56  ;;  %476 = vmatpush1.bf16.msra.mxu1 %v2091_v57  ;;  %v2140_v56 = vld [vmem:[%s2923_s4 + $0x1f8] ss:$12 sps:$4 sm:$0xff]   ;;  %v2148_v57 = vld [vmem:[%s2923_s4 + $0x214] ss:$12 sps:$4 sm:$0xff]  }
  0x34   :  { %1790 = vmatprep.subr.msk.bf16.mxu0 %vm397_vm2, %v1787_v59  ;;  %1792 = vmatprep.subr.msk.bf16.mxu1 %vm397_vm2, %v1789_v60  ;;  %v2181_v59 = vld [vmem:[%s2923_s4 + $0x124] ss:$12 sps:$4 sm:$0xff]  }
  0x35   :  { %v2146_v60 = vld [vmem:[%s2923_s4 + $0x210] ss:$12 sps:$4 sm:$0xff]  }
  0x37   :  { %437 = vmatpush1.bf16.msra.mxu0 %v399_v62  ;;  %478 = vmatpush1.bf16.msra.mxu1 %v405_v0  ;;  %v2179_v62 = vld [vmem:[%s2923_s4 + $0x120] ss:$12 sps:$4 sm:$0xff]   ;;  %v2152_v0 = vld [vmem:[%s2923_s4 + $0x228] ss:$12 sps:$4 sm:$0xff]  }
  0x38   :  { %695 = vmatprep.subr.bf16.mxu1 %v2098_v1  ;;  %1288 = vmatprep.subr.bf16.mxu0 %v2109_v4  ;;  %v2160_v1 = vld [vmem:[%s2923_s4 + $0x244] ss:$12 sps:$4 sm:$0xff]  }
  0x39   :  { %v2185_v4 = vld [vmem:[%s2923_s4 + $0x138] ss:$12 sps:$4 sm:$0xff]  }
  0x3a   :  { %443 = vmatmul.mubr.bf16.vlgmr.msra.gmra.mrb[0].mxu0 %v43_v6  ;;  %484 = vmatmul.mubr.bf16.vlgmr.msra.gmra.mrb[0].mxu1 %v43_v6  ;;  %v2166_v6 = vld [vmem:[%s2923_s4 + $0x25c] ss:$12 sps:$4 sm:$0xff]  }
  0x3b   :  { %696 = vmatpush1.bf16.msra.mxu1 %v2096_v8  ;;  %727 = vmatprep.mubr.bf16.mxu1 %v2253_v15  ;;  %v2172_v8 = vld [vmem:[%s2923_s4 + $0x274] ss:$12 sps:$4 sm:$0xff]  }
  0x3c   :  { %697 = vmatprep.subr.bf16.mxu1 %v2101_v9  ;;  %1289 = vmatpush1.bf16.msra.mxu0 %v2107_v11  ;;  %v2170_v9 = vld [vmem:[%s2923_s4 + $0x270] ss:$12 sps:$4 sm:$0xff]   ;;  %v2176_v11 = vld [vmem:[%s2923_s4 + $0x288] ss:$12 sps:$4 sm:$0xff]  }
  0x3d   :  { %1290 = vmatprep.subr.bf16.mxu0 %v2115_v2  ;;  %v2182_v2 = vld [vmem:[%s2923_s4 + $0x2a0] ss:$12 sps:$4 sm:$0xff]  }
  0x3e   :  { %v2193_v15 = vld [vmem:[%s2923_s4 + $0x154] ss:$12 sps:$4 sm:$0xff]  }
  0x3f   :  { %698 = vmatpush1.bf16.msra.mxu1 %v2099_v13  ;;  %v2190_v13 = vld [vmem:[%s2923_s4 + $0x2bc] ss:$12 sps:$4 sm:$0xff]  }
  0x40   :  { %699 = vmatprep.subr.bf16.mxu1 %v690_v16  ;;  %1291 = vmatpush1.bf16.msra.mxu0 %v2113_v17  ;;  %v2196_v16 = vld [vmem:[%s2923_s4 + $0x2d4] ss:$12 sps:$4 sm:$0xff]   ;;  %v2191_v17 = vld [vmem:[%s2923_s4 + $0x150] ss:$12 sps:$4 sm:$0xff]  }
  0x41   :  { %1292 = vmatprep.subr.bf16.mxu0 %v2121_v18  ;;  %v2194_v18 = vld [vmem:[%s2923_s4 + $0x2d0] ss:$12 sps:$4 sm:$0xff]  }
  0x43   :  { %700 = vmatpush1.bf16.msra.mxu1 %v687_v19  ;;  %v2199_v19 = vld [vmem:[%s2923_s4 + $0x16c] ss:$12 sps:$4 sm:$0xff]  }
  0x44   :  { %1994 = vmatprep.subr.bf16.mxu1 %v2254_v25  ;;  %1293 = vmatpush1.bf16.msra.mxu0 %v2119_v21  ;;  %v2197_v21 = vld [vmem:[%s2923_s4 + $0x168] ss:$12 sps:$4 sm:$0xff]  }
  0x45   :  { %1294 = vmatprep.subr.bf16.mxu0 %v2127_v22  ;;  %v2200_v22 = vld [vmem:[%s2923_s4 + $0x2e8] ss:$12 sps:$4 sm:$0xff]  }
  0x46   :  { %1803 = vmatmul.mubr.msk.bf16.vlgmr.msra.gmra.mrb[4].mxu1 %vm678_vm4, %v46_v23 }
  0x47   :  { %1995 = vmatpush3.bf16.msra.mxu1 %v2104_v24  ;;  %2000 = vmatprep.mubr.msk.bf16.mxu1 %vm2255_vm5, %v2254_v25  ;;  %v2204_v24 = vld [vmem:[%s2923_s4 + $0x248] ss:$12 sps:$4 sm:$0xff]  }
  0x48   :  { %1996 = vmatprep.subr.bf16.mxu1 %v2254_v25  ;;  %1295 = vmatpush1.bf16.msra.mxu0 %v2125_v26  ;;  %v103_v26 = vlaneseq }
  0x49   :  { %1296 = vmatprep.subr.bf16.mxu0 %v2133_v27 }
  0x4a   :  { %v2722_v27 = vshrl.u32 %v103_v26, 7 }
  0x4b   :  { %1997 = vmatpush3.bf16.msra.mxu1 %v2105_v28 }
  0x4c   :  { %1998 = vmatprep.subr.bf16.mxu1 %v2254_v25  ;;  %1297 = vmatpush1.bf16.msra.mxu0 %v2131_v30  ;;  %v105_v28 = vsub.s32 0, %v2722_v27  ;;  %v113_v29 = vsub.s32 2, %v2722_v27  ;;  %v101_v30 = vld [vmem:[%s2926_s3] sm:$0xf] }
  0x4d   :  { %1298 = vmatprep.subr.bf16.mxu0 %v2139_v31  ;;  %v109_v31 = vsub.s32 1, %v2722_v27 }
  0x4f   :  { %1999 = vmatpush3.bf16.msra.mxu1 %v693_v32  ;;  %v117_v32 = vsub.s32 3, %v2722_v27  ;;  %v1901_v27 = vld [vmem:[%s2929_s8] ss:$0 sm:$0xff] }
  0x50   :  { %1329 = vmatprep.subr.bf16.mxu1 %v2112_v33  ;;  %1299 = vmatpush1.bf16.msra.mxu0 %v2137_v34  ;;  %v106_v33 = vrot.slane %v101_v30, %v105_v28  ;;  %v114_v34 = vrot.slane %v101_v30, %v113_v29 }
  0x51   :  { %1300 = vmatprep.subr.bf16.mxu0 %v2145_v36  ;;  %v118_v36 = vrot.slane %v101_v30, %v117_v32  ;;  %v2230_v32 = vld [vmem:[%s2923_s4 + $0x218] ss:$12 sps:$4 sm:$0xff]  }
  0x52   :  { %2001 = vmatmul.mubr.msk.bf16.vlgmr.msra.gmra.mrb[8].mxu1 %vm678_vm4, %v46_v23  ;;  %v2203_v23 = vld [vmem:[%s2923_s4 + $0xc8] ss:$12 sps:$4 sm:$0xff]  }
  0x53   :  { %1330 = vmatpush1.bf16.msra.mxu1 %v2110_v35  ;;  %v110_v35 = vrot.slane %v101_v30, %v109_v31  ;;  %v2229_v30 = vld [vmem:[%s2923_s4 + $0x98] ss:$12 sps:$4 sm:$0xff]  }
  0x54   :  { %1331 = vmatprep.subr.bf16.mxu1 %v2118_v37  ;;  %1301 = vmatpush1.bf16.msra.mxu0 %v2143_v38 }
  0x55   :  { %1302 = vmatprep.subr.bf16.mxu0 %v2151_v39 }
  0x57   :  { %1332 = vmatpush1.bf16.msra.mxu1 %v2116_v40 }
  0x58   :  { %1333 = vmatprep.subr.bf16.mxu1 %v2124_v41  ;;  %1303 = vmatpush1.bf16.msra.mxu0 %v2149_v42 }
  0x59   :  { %1304 = vmatprep.subr.bf16.mxu0 %v2157_v43 }
  0x5b   :  { %1334 = vmatpush1.bf16.msra.mxu1 %v2122_v44 }
  0x5c   :  { %1335 = vmatprep.subr.bf16.mxu1 %v2130_v45  ;;  %1305 = vmatpush1.bf16.msra.mxu0 %v2155_v46 }
  0x5d   :  { %1306 = vmatprep.subr.bf16.mxu0 %v2163_v47 }
  0x5f   :  { %1336 = vmatpush1.bf16.msra.mxu1 %v2128_v48 }
  0x60   :  { %1337 = vmatprep.subr.bf16.mxu1 %v2136_v49  ;;  %1307 = vmatpush1.bf16.msra.mxu0 %v2161_v50 }
  0x61   :  { %1308 = vmatprep.subr.bf16.mxu0 %v2169_v51 }
  0x63   :  { %1338 = vmatpush1.bf16.msra.mxu1 %v2134_v52 }
  0x64   :  { %1339 = vmatprep.subr.bf16.mxu1 %v2142_v53  ;;  %1309 = vmatpush1.bf16.msra.mxu0 %v2167_v54 }
  0x65   :  { %1310 = vmatprep.subr.bf16.mxu0 %v2175_v55 }
  0x67   :  { %1340 = vmatpush1.bf16.msra.mxu1 %v2140_v56  ;;  %v2205_v56 = vld [vmem:[%s2923_s4 + $0x8] ss:$12 sps:$4 sm:$0xff]  }
  0x68   :  { %1341 = vmatprep.subr.bf16.mxu1 %v2148_v57  ;;  %1311 = vmatpush1.bf16.msra.mxu0 %v2173_v58  ;;  %v2206_v57 = vld [vmem:[%s2923_s4 + $0x188] ss:$12 sps:$4 sm:$0xff]  }
  0x69   :  { %1312 = vmatprep.subr.bf16.mxu0 %v2181_v59  ;;  %v2207_v59 = vld [vmem:[%s2923_s4 + $0xe0] ss:$12 sps:$4 sm:$0xff]  }
  0x6b   :  { %1342 = vmatpush1.bf16.msra.mxu1 %v2146_v60  ;;  %v2208_v60 = vld [vmem:[%s2923_s4 + $0x260] ss:$12 sps:$4 sm:$0xff]  }
  0x6c   :  { %1343 = vmatprep.subr.bf16.mxu1 %v2154_v61  ;;  %1313 = vmatpush1.bf16.msra.mxu0 %v2179_v62  ;;  %v2209_v61 = vld [vmem:[%s2923_s4 + $0x20] ss:$12 sps:$4 sm:$0xff]  }
  0x6d   :  { %1314 = vmatprep.subr.bf16.mxu0 %v2187_v63  ;;  %v2210_v62 = vld [vmem:[%s2923_s4 + $0x1a0] ss:$12 sps:$4 sm:$0xff]   ;;  %v2211_v63 = vld [vmem:[%s2923_s4 + $0xf8] ss:$12 sps:$4 sm:$0xff]  }
  0x6f   :  { %1344 = vmatpush1.bf16.msra.mxu1 %v2152_v0  ;;  %v2212_v0 = vld [vmem:[%s2923_s4 + $0x278] ss:$12 sps:$4 sm:$0xff]  }
  0x70   :  { %1345 = vmatprep.subr.bf16.mxu1 %v2160_v1  ;;  %1315 = vmatpush1.bf16.msra.mxu0 %v2185_v4 }
  0x71   :  { %1316 = vmatprep.subr.bf16.mxu0 %v2193_v15  ;;  %v2222_v15 = vld [vmem:[%s2923_s4 + $0x1e8] ss:$12 sps:$4 sm:$0xff]  }
  0x73   :  { %1346 = vmatpush1.bf16.msra.mxu1 %v2158_v5  ;;  %v2213_v5 = vld [vmem:[%s2923_s4 + $0x38] ss:$12 sps:$4 sm:$0xff]  }
  0x74   :  { %1347 = vmatprep.subr.bf16.mxu1 %v2166_v6  ;;  %1317 = vmatpush1.bf16.msra.mxu0 %v2191_v17  ;;  %v2214_v6 = vld [vmem:[%s2923_s4 + $0x1b8] ss:$12 sps:$4 sm:$0xff]   ;;  %v2224_v17 = vld [vmem:[%s2923_s4 + $0x2c0] ss:$12 sps:$4 sm:$0xff]  }
  0x75   :  { %1318 = vmatprep.subr.bf16.mxu0 %v2199_v19 }
  0x77   :  { %1348 = vmatpush1.bf16.msra.mxu1 %v2164_v7 }
  0x78   :  { %1349 = vmatprep.subr.bf16.mxu1 %v2172_v8  ;;  %1319 = vmatpush1.bf16.msra.mxu0 %v2197_v21  ;;  %v2215_v8 = vld [vmem:[%s2923_s4 + $0x110] ss:$12 sps:$4 sm:$0xff]   ;;  %v2226_v21 = vld [vmem:[%s2923_s4 + $0x200] ss:$12 sps:$4 sm:$0xff]  }
  0x79   :  { %1926 = vmatprep.subr.bf16.mxu0 %v2203_v23  ;;  %v2227_v23 = vld [vmem:[%s2923_s4 + $0x158] ss:$12 sps:$4 sm:$0xff]  }
  0x7b   :  { %1350 = vmatpush1.bf16.msra.mxu1 %v2170_v9  ;;  %v2216_v9 = vld [vmem:[%s2923_s4 + $0x290] ss:$12 sps:$4 sm:$0xff]  }
  0x7c   :  { %1351 = vmatprep.subr.bf16.mxu1 %v2178_v10 }
  0x7f   :  { %1352 = vmatpush1.bf16.msra.mxu1 %v2176_v11  ;;  %v2217_v11 = vld [vmem:[%s2923_s4 + $0x50] ss:$12 sps:$4 sm:$0xff]  }
  0x80   :  { %1353 = vmatprep.subr.bf16.mxu1 %v2184_v12  ;;  %v2218_v12 = vld [vmem:[%s2923_s4 + $0x1d0] ss:$12 sps:$4 sm:$0xff]  }
  0x83   :  { %1354 = vmatpush1.bf16.msra.mxu1 %v2182_v2  ;;  %v2219_v2 = vld [vmem:[%s2923_s4 + $0x128] ss:$12 sps:$4 sm:$0xff]  }
  0x84   :  { %1355 = vmatprep.subr.bf16.mxu1 %v2190_v13  ;;  %v2220_v13 = vld [vmem:[%s2923_s4 + $0x2a8] ss:$12 sps:$4 sm:$0xff]  }
  0x87   :  { %1356 = vmatpush1.bf16.msra.mxu1 %v2188_v14  ;;  %v2221_v14 = vld [vmem:[%s2923_s4 + $0x68] ss:$12 sps:$4 sm:$0xff]  }
  0x88   :  { %1357 = vmatprep.subr.bf16.mxu1 %v2196_v16  ;;  %v2223_v16 = vld [vmem:[%s2923_s4 + $0x140] ss:$12 sps:$4 sm:$0xff]  }
  0x8b   :  { %1358 = vmatpush1.bf16.msra.mxu1 %v2194_v18 }
  0x8c   :  { %1359 = vmatprep.subr.bf16.mxu1 %v2202_v20  ;;  %v2225_v20 = vld [vmem:[%s2923_s4 + $0x80] ss:$12 sps:$4 sm:$0xff]  }
  0x8f   :  { %1360 = vmatpush1.bf16.msra.mxu1 %v2200_v22 }
  0x90   :  { %1948 = vmatprep.subr.bf16.mxu1 %v2204_v24  ;;  %v2228_v24 = vld [vmem:[%s2923_s4 + $0x2d8] ss:$12 sps:$4 sm:$0xff]  }
 0x10d   :  { %v444_v37 = vpop.f32.mrb[0].mxu0  ;;  %v485_v38 = vpop.f32.mrb[0].mxu1 }
 0x10e   :  { %v445_v39 = vadd.f32 %v444_v37, %v106_v33  ;;  %v486_v40 = vadd.f32 %v485_v38, %v114_v34  ;;  %v446_v41 = vpop.f32.mrb[1].mxu0  ;;  %v487_v42 = vpop.f32.mrb[1].mxu1  ;;  %v2231_v33 = vld [vmem:[%s2923_s4 + $0x170] ss:$12 sps:$4 sm:$0xff]   ;;  %v2235_v37 = vld [vmem:[%s2925_s7 + $0x40] sm:$0xff]  }
 0x10f   :  { %v447_v43 = vadd.f32 %v446_v41, %v110_v35  ;;  %v488_v44 = vadd.f32 %v487_v42, %v118_v36  ;;  %v448_v45 = vpop.f32.mrb[2].mxu0  ;;  %v489_v46 = vpop.f32.mrb[2].mxu1  ;;  %v2232_v34 = vld [vmem:[%s2923_s4 + $0x2f0] ss:$12 sps:$4 sm:$0xff]   ;;  %v2236_v38 = vld [vmem:[%s2925_s7] sm:$0xff]  }
 0x110   :  { %v492_v47 = vmax.f32 %v445_v39, 0.0  ;;  %v494_v48 = vmax.f32 %v486_v40, 0.0  ;;  %v449_v49 = vpop.f32.mrb[3].mxu0  ;;  %v490_v50 = vpop.f32.mrb[3].mxu1  ;;  %v2233_v35 = vld [vmem:[%s2923_s4 + $0xb0] ss:$12 sps:$4 sm:$0xff]  }
 0x111   :  { %v493_v51 = vmax.f32 %v447_v43, 0.0  ;;  %v495_v52 = vmax.f32 %v488_v44, 0.0  ;;  %v2234_v36 = vld [vmem:[%s2923_s4 + $0x230] ss:$12 sps:$4 sm:$0xff]   ;;  %v2237_v39 = vld [vmem:[%s2925_s7 + $0x48] sm:$0xff]   ;;  %v2243_v44 = vld [vmem:[%s2925_s7 + $0x60] sm:$0xff]  }
 0x112   :  { %v2737_v53 = vpack.c.bf16 %v494_v48, %v494_v48  ;;  %v2745_v58 = vpack.c.bf16 %v492_v47, %v492_v47  ;;  %v2238_v40 = vld [vmem:[%s2925_s7 + $0x8] sm:$0xff]   ;;  %v2239_v41 = vld [vmem:[%s2925_s7 + $0x50] sm:$0xff]   ;;  %v2241_v43 = vld [vmem:[%s2925_s7 + $0x58] sm:$0xff]  }
 0x113   :  { %v497_v54 = vpack.c.bf16 %v493_v51, %v493_v51  ;;  %v499_v55 = vpack.c.bf16 %v495_v52, %v495_v52  ;;  %v2240_v42 = vld [vmem:[%s2925_s7 + $0x10] sm:$0xff]   ;;  %v2244_v45 = vld [vmem:[%s2925_s7 + $0x20] sm:$0xff]   ;;  %v2245_v46 = vld [vmem:[%s2925_s7 + $0x68] sm:$0xff]  }
 0x114   :  { %v2246_v47 = vld [vmem:[%s2925_s7 + $0x28] sm:$0xff]   ;;  %v2247_v48 = vld [vmem:[%s2925_s7 + $0x70] sm:$0xff]   ;;  %v2249_v50 = vld [vmem:[%s2925_s7 + $0x78] sm:$0xff]  }
 0x115   :  { %1320 = vmatprep.mubr.bf16.mxu0 %v497_v54  ;;  %1361 = vmatprep.mubr.bf16.mxu1 %v499_v55  ;;  %v2248_v49 = vld [vmem:[%s2925_s7 + $0x30] sm:$0xff]   ;;  %v2250_v51 = vld [vmem:[%s2925_s7 + $0x38] sm:$0xff]   ;;  %v2251_v52 = vld [vmem:[%s2925_s7 + $0x80] sm:$0x1f]  }
 0x116   :  { %1321 = vmatmul.mubr.bf16.vlgmr.msra.gmra.mrb[4].mxu0 %v2745_v58  ;;  %1362 = vmatmul.mubr.bf16.vlgmr.msra.gmra.mrb[12].mxu1 %v2737_v53 }
 0x117   :  { %1927 = vmatpush3.bf16.msra.mxu0 %v2205_v56  ;;  %1949 = vmatpush3.bf16.msra.mxu1 %v2206_v57 }
 0x118   :  { %1402 = vmatprep.mubr.bf16.mxu0 %v497_v54  ;;  %1442 = vmatprep.mubr.bf16.mxu1 %v499_v55  ;;  %v1450_v55 = vld [vmem:[%s2927_s6] sm:$0x7] }
 0x119   :  { %1928 = vmatprep.subr.bf16.mxu0 %v2207_v59  ;;  %1950 = vmatprep.subr.bf16.mxu1 %v2208_v60  ;;  %v2767_v1 = vpop.f32.mrb[4].mxu1  ;;  %v1455_v59 = vrot.slane %v1450_v55, %v105_v28 }
 0x11a   :  { %v2769_v4 = vpop.f32.mrb[5].mxu1 }
 0x11b   :  { %1929 = vmatpush3.bf16.msra.mxu0 %v2209_v61  ;;  %1951 = vmatpush3.bf16.msra.mxu1 %v2210_v62  ;;  %v733_v7 = vpop.f32.mrb[6].mxu1 }
 0x11c   :  { %1930 = vmatprep.subr.bf16.mxu0 %v2211_v63  ;;  %1952 = vmatprep.subr.bf16.mxu1 %v2212_v0  ;;  %v734_v10 = vpop.f32.mrb[7].mxu1 }
 0x11f   :  { %1931 = vmatpush3.bf16.msra.mxu0 %v2213_v5  ;;  %1953 = vmatpush3.bf16.msra.mxu1 %v2214_v6 }
 0x120   :  { %1932 = vmatprep.subr.bf16.mxu0 %v2215_v8  ;;  %1954 = vmatprep.subr.bf16.mxu1 %v2216_v9 }
 0x123   :  { %1933 = vmatpush3.bf16.msra.mxu0 %v2217_v11  ;;  %1955 = vmatpush3.bf16.msra.mxu1 %v2218_v12 }
 0x124   :  { %1934 = vmatprep.subr.bf16.mxu0 %v2219_v2  ;;  %1956 = vmatprep.subr.bf16.mxu1 %v2220_v13 }
 0x125   :  { %v2807_v18 = vpop.f32.mrb[8].mxu1 }
 0x126   :  { %v2002_v19 = vpop.f32.mrb[9].mxu1 }
 0x127   :  { %1935 = vmatpush3.bf16.msra.mxu0 %v2221_v14  ;;  %1957 = vmatpush3.bf16.msra.mxu1 %v2222_v15  ;;  %v773_v22 = vpop.f32.mrb[10].mxu1 }
 0x128   :  { %1936 = vmatprep.subr.bf16.mxu0 %v2223_v16  ;;  %1958 = vmatprep.subr.bf16.mxu1 %v2224_v17  ;;  %v2003_v26 = vpop.f32.mrb[11].mxu1  ;;  %v1463_v22 = vrot.slane %v1450_v55, %v113_v29 }
 0x12b   :  { %1937 = vmatpush3.bf16.msra.mxu0 %v2225_v20  ;;  %1959 = vmatpush3.bf16.msra.mxu1 %v2226_v21 }
 0x12c   :  { %1938 = vmatprep.subr.bf16.mxu0 %v2227_v23  ;;  %1960 = vmatprep.subr.bf16.mxu1 %v2228_v24 }
 0x12f   :  { %1939 = vmatpush3.bf16.msra.mxu0 %v2229_v30  ;;  %1961 = vmatpush3.bf16.msra.mxu1 %v2230_v32  ;;  %v16_v32 = vstv %s2928_s10 }
 0x130   :  { %1940 = vmatprep.subr.bf16.mxu0 %v2231_v33  ;;  %1962 = vmatprep.subr.bf16.mxu1 %v2232_v34  ;;  %17 = vst [vmem:[#allocation2] sm:$0x1] %v16_v32 }
 0x133   :  { %1941 = vmatpush3.bf16.msra.mxu0 %v2233_v35  ;;  %1963 = vmatpush3.bf16.msra.mxu1 %v2234_v36 }
 0x134   :  { %1970 = vmatprep.subr.bf16.mxu0 %v2235_v37  ;;  %2004 = vmatprep.subr.bf16.mxu1 %v2254_v25 }
 0x136   :  { %1403 = vmatmul.mubr.bf16.vlgmr.msra.gmra.mrb[8].mxu0 %v2745_v58  ;;  %1443 = vmatmul.mubr.bf16.vlgmr.msra.gmra.mrb[16].mxu1 %v2737_v53  ;;  %v1624_v53 = vsel %vm1622_vm6, %v2324_v3, 0  ;;  %v1459_v3 = vrot.slane %v1450_v55, %v109_v31 }
 0x137   :  { %1971 = vmatpush3.bf16.msra.mxu0 %v2236_v38  ;;  %2006 = vmatprep.mubr.msk.bf16.mxu1 %vm2255_vm5, %v2254_v25  ;;  %v2242_v25 = vld [vmem:[%s2925_s7 + $0x18] sm:$0xff]   ;;  %v1626_v54 = vand.u32 %v2251_v52, %v1624_v53 }
 0x138   :  { %1972 = vmatprep.subr.bf16.mxu0 %v2237_v39 }
 0x139   :  { %2005 = vmatpush3.bf16.msra.mxu1 %v1626_v54 }
 0x13b   :  { %1973 = vmatpush3.bf16.msra.mxu0 %v2238_v40 }
 0x13c   :  { %1974 = vmatprep.subr.bf16.mxu0 %v2239_v41  ;;  %v1920_v41 = vld [vmem:[%s2930_s9] ss:$0 sm:$0xff] }
 0x13f   :  { %1975 = vmatpush3.bf16.msra.mxu0 %v2240_v42 }
 0x140   :  { %1976 = vmatprep.subr.bf16.mxu0 %v2241_v43 }
 0x143   :  { %1977 = vmatpush3.bf16.msra.mxu0 %v2242_v25 }
 0x144   :  { %1978 = vmatprep.subr.bf16.mxu0 %v2243_v44  ;;  %v1921_v44 = vld [vmem:[#allocation2] ss:$0 sm:$0xff] }
 0x147   :  { %1979 = vmatpush3.bf16.msra.mxu0 %v2244_v45 }
 0x148   :  { %1980 = vmatprep.subr.bf16.mxu0 %v2245_v46 }
 0x14b   :  { %1981 = vmatpush3.bf16.msra.mxu0 %v2246_v47 }
 0x14c   :  { %1982 = vmatprep.subr.bf16.mxu0 %v2247_v48 }
 0x14f   :  { %1983 = vmatpush3.bf16.msra.mxu0 %v2248_v49 }
 0x150   :  { %1984 = vmatprep.subr.bf16.mxu0 %v2249_v50 }
 0x153   :  { %1985 = vmatpush3.bf16.msra.mxu0 %v2250_v51 }
 0x1e9   :  { %v1322_v56 = vpop.f32.mrb[4].mxu0  ;;  %v1363_v57 = vpop.f32.mrb[12].mxu1 }
 0x1ea   :  { %v1323_v58 = vadd.f32 %v1322_v56, %v2767_v1  ;;  %v1324_v60 = vpop.f32.mrb[5].mxu0  ;;  %v1365_v61 = vpop.f32.mrb[13].mxu1 }
 0x1eb   :  { %v1325_v62 = vadd.f32 %v1324_v60, %v2769_v4  ;;  %v1326_v63 = vpop.f32.mrb[6].mxu0  ;;  %v1367_v0 = vpop.f32.mrb[14].mxu1 }
 0x1ec   :  { %v1364_v5 = vadd.f32 %v1363_v57, %v1323_v58  ;;  %v1327_v6 = vpop.f32.mrb[7].mxu0  ;;  %v1368_v7 = vpop.f32.mrb[15].mxu1 }
 0x1ed   :  { %v1366_v8 = vadd.f32 %v1365_v61, %v1325_v62 }
 0x1ee   :  { %v1467_v9 = vadd.f32 %v1455_v59, %v1364_v5 }
 0x1ef   :  { %v1468_v10 = vadd.f32 %v1459_v3, %v1366_v8 }
 0x1f0   :  { %v1470_v11 = vmax.f32 %v1467_v9, 0.0 }
 0x1f1   :  { %v1471_v1 = vmax.f32 %v1468_v10, 0.0 }
 0x1f2   :  { %v1473_v2 = vpack.c.bf16 %v1470_v11, %v1470_v11 }
 0x1f3   :  { %v1474_v12 = vpack.c.bf16 %v1471_v1, %v1471_v1 }
 0x1f5   :  { %1660 = vmatprep.mubr.bf16.mxu0 %v1474_v12 }
 0x1f6   :  { %1661 = vmatmul.mubr.bf16.vlgmr.msra.gmra.mrb[12].mxu0 %v1473_v2 }
 0x209   :  { %v1942_v28 = vpop.f32.mrb[8].mxu0  ;;  %v1964_v13 = vpop.f32.mrb[16].mxu1 }
 0x20a   :  { %v1943_v4 = vpop.f32.mrb[9].mxu0  ;;  %v1965_v14 = vpop.f32.mrb[17].mxu1 }
 0x20b   :  { %v1944_v15 = vadd.f32 %v1943_v4, %v1942_v28  ;;  %v1966_v31 = vadd.f32 %v1965_v14, %v1964_v13  ;;  %v1945_v16 = vpop.f32.mrb[10].mxu0  ;;  %v1967_v17 = vpop.f32.mrb[18].mxu1 }
 0x20c   :  { %v1946_v19 = vpop.f32.mrb[11].mxu0  ;;  %v1968_v20 = vpop.f32.mrb[19].mxu1 }
 0x20d   :  { %v1405_v21 = vadd.f32 %v1944_v15, %v2807_v18 }
 0x20f   :  { %v1445_v23 = vadd.f32 %v1966_v31, %v1405_v21 }
 0x211   :  { %v1469_v24 = vadd.f32 %v1463_v22, %v1445_v23 }
 0x213   :  { %v1472_v26 = vmax.f32 %v1469_v24, 0.0 }
 0x215   :  { %v1475_v30 = vpack.c.bf16 %v1472_v26, %v1472_v26 }
 0x217   :  { %2007 = vmatmul.mubr.msk.bf16.vlgmr.msra.gmra.mrb[20].mxu1 %vm1618_vm7, %v1475_v30 }
 0x2c9   :  { %v1986_v33 = vpop.f32.mrb[12].mxu0 }
 0x2ca   :  { %v1987_v34 = vpop.f32.mrb[13].mxu0 }
 0x2cb   :  { %v1988_v35 = vadd.f32 %v1987_v34, %v1986_v33  ;;  %v1989_v36 = vpop.f32.mrb[14].mxu0 }
 0x2cc   :  { %v1990_v37 = vpop.f32.mrb[15].mxu0 }
 0x2cd   :  { %v1663_v29 = vadd.f32 %v1988_v35, %v1901_v27 }
 0x2ea   :  { %v1702_v18 = vpop.f32.mrb[20].mxu1 }
 0x2eb   :  { %v1703_v38 = vadd.f32 %v1702_v18, %v1663_v29  ;;  %v2008_v39 = vpop.f32.mrb[21].mxu1 }
 0x2ec   :  { %v1705_v40 = vpop.f32.mrb[22].mxu1 }
 0x2ed   :  { %v1708_v42 = vmax.f32 %v1703_v38, 0.0  ;;  %v2009_v43 = vpop.f32.mrb[23].mxu1 }
 0x2ef   :  { %v1716_v25 = vmul.f32 %v1920_v41, %v1708_v42 }
 0x2f1   :  { %1717 = vadd.xlane.f32.xlu0 %v1716_v25 }
 0x37e   :  { %v1718_v45 = vpop.xlane.xlu0 %1717 }
 0x37f   :  { %v1726_v46 = vadd.f32 %v1921_v44, %v1718_v45 }
 0x381   :  { %v1727_v47 = vmax.f32 %v1726_v46, 0.0 }
 0x383   :  { %1729 = vst.msk [vmem:[%s2931_s11] sm:$0xff] %vm1728_vm8, %v1727_v47 }

</bundles_post_ra>
